<compile_context>
chip_gen: v6e
topology: v6e:2x2x1
jax: 0.10.0
libtpu: 0.0.40
codegen_flags: <defaults>
</compile_context>

<pallas_src>
import functools

import jax
import jax.numpy as jnp
from jax import lax
from jax.experimental import pallas as pl
from jax.experimental.pallas import tpu as pltpu


# ----------------------------------------------------------------------------
# Helpers
# ----------------------------------------------------------------------------
def _binarize(x, dtype):
    """sign(x) with sign(0) = 0 (matches torch.sign), emitted directly in dtype."""
    one = jnp.array(1, dtype)
    neg_one = jnp.array(-1, dtype)
    zero = jnp.array(0, dtype)
    return jnp.where(x > 0, one, jnp.where(x < 0, neg_one, zero))


def _round_up(v, m):
    return (v + m - 1) // m * m


def _tpu_caps():
    """Best-effort (VMEM bytes per TensorCore, TensorCore count)."""
    vmem = 64 * 1024 * 1024            # conservative fallback (v7x-sized)
    num_tc = 1
    try:
        get_info = getattr(pltpu, "get_tpu_info", None)
        if get_info is not None:
            info = get_info()
            vmem = int(getattr(info, "vmem_capacity_bytes", vmem))
            for name in ("num_cores", "core_count", "num_tensorcores",
                         "tensorcore_count"):
                v = getattr(info, name, None)
                if isinstance(v, int) and v > 0:
                    num_tc = v
                    break
            else:
                # Heuristic: 64 MiB VMEM per TC => v7x-class => 2 TCs per chip.
                num_tc = 2 if vmem <= 64 * 1024 * 1024 else 1
    except Exception:
        pass
    return vmem, num_tc


# ----------------------------------------------------------------------------
# Pass 1: Cout-independent per-channel statistics of the binary conv output.
#   s = sum over pixels of x_b           (Cin, 1)
#   G = sum over pixels of x_b x_b^T     (Cin, Cin)
# (sum_y = W_b s ; ssq_y = diag(W_b G W_b^T) are tiny wrapper-side matmuls.)
# ----------------------------------------------------------------------------
def _stats_kernel(x_ref, gram_ref, sum_ref, *, binarize_input):
    b = pl.program_id(1)
    s = pl.program_id(2)

    @pl.when((b == 0) & (s == 0))
    def _():
        gram_ref[...] = jnp.zeros_like(gram_ref)
        sum_ref[...] = jnp.zeros_like(sum_ref)

    x = x_ref[0]                                  # (Cin, TS) f32
    if binarize_input:                            # input.size(1) != 3
        xb = _binarize(x, jnp.float32)            # exact +-1/0; f32 for exact sum
        x_mm = xb.astype(jnp.bfloat16)            # MXU operand
    else:
        xb = x
        x_mm = x

    sum_ref[0] += jnp.sum(xb, axis=1, keepdims=True)          # (Cin, 1)
    # x_b @ x_b^T with contraction on the lane axis (no explicit transpose).
    gram_ref[0] += lax.dot_general(
        x_mm, x_mm, (((1,), (1,)), ((), ())),
        preferred_element_type=jnp.float32)                    # (Cin, Cin)


# ----------------------------------------------------------------------------
# Pass 2: binary 1x1 conv, folded BatchNorm affine + Hardtanh.
# ----------------------------------------------------------------------------
def _conv_bn_htanh_kernel(x_ref, w_ref, scale_ref, shift_ref, o_ref, *,
                          binarize_input, int_matmul):
    x = x_ref[0]                                  # (Cin, TS) f32
    w = w_ref[...]                                # (Cout, Cin) pre-binarized
    if binarize_input:
        x = _binarize(x, w.dtype)                 # compare+select -> MXU dtype
    if int_matmul:                                # opt-in int8 path (v5e/v6e)
        y = jnp.dot(w, x, preferred_element_type=jnp.int32).astype(jnp.float32)
    else:
        y = jnp.dot(w, x, preferred_element_type=jnp.float32)  # (Cout, TS)
    y = y * scale_ref[...] + shift_ref[...]       # folded BatchNorm affine
    o_ref[0] = jnp.clip(y, -1.0, 1.0).astype(o_ref.dtype)      # Hardtanh [-1, 1]


# ----------------------------------------------------------------------------
# Wrapper
# ----------------------------------------------------------------------------
def binary_conv2d_fusion_increase(x_nchw, weight, gamma, beta, *,
                                  eps=1e-5, spatial_tile=None,
                                  out_dtype=jnp.float32,
                                  use_int8_matmul=False):
    """
    x_nchw : (N, Cin, H, W)    float32
    weight : (Cout, Cin, 1, 1) float32  (binarized here / in-kernel)
    gamma  : (Cout,)           BatchNorm affine scale
    beta   : (Cout,)           BatchNorm affine shift
    returns: (N, Cout, H, W)   out_dtype (default float32)
    """
    n, cin, h, w_sp = x_nchw.shape
    cout = weight.shape[0]
    hw = h * w_sp
    m_real = float(n * hw)
    binarize_input = (cin != 3)                   # matches `if input.size(1) != 3`
    # int8 MXU operands only help when compute-bound on v5e/v6e; v7x has no
    # integer MXU path, so this stays an explicit opt-in.
    int_matmul = bool(use_int8_matmul and binarize_input)
    mxu_dtype = (jnp.int8 if int_matmul
                 else (jnp.bfloat16 if binarize_input else jnp.float32))

    # NCHW-native view with spatial on the lane axis; no transposes anywhere.
    x3 = x_nchw.reshape(n, cin, hw).astype(jnp.float32)
    w_mat = weight.reshape(cout, cin).astype(jnp.float32)
    wb32 = jnp.sign(w_mat)                        # Binarize(weight), sign(0)=0
    w_mxu = wb32.astype(mxu_dtype)                # pre-binarized MXU operand

    # ---- generation-aware tile / VMEM policy --------------------------------
    vmem_cap, num_tc = _tpu_caps()
    tile_budget = int(vmem_cap * 0.45)            # total double-buffered tile bytes
    vmem_limit = int(vmem_cap * 0.80)             # scoped VMEM limit for Mosaic

    cin_pad = _round_up(cin, 8)                   # f32 sublane round-up
    out_itemsize = jnp.dtype(out_dtype).itemsize
    cout_pad_out = _round_up(cout, 32 // out_itemsize)
    hw128 = _round_up(hw, 128)

    # Pass 2: double-buffered f32 input tile + double-buffered output tile.
    p2_bytes_per_col = 2 * (4 * cin_pad + out_itemsize * cout_pad_out)
    ts2 = max(128, (tile_budget // p2_bytes_per_col) // 128 * 128)
    if spatial_tile is not None:
        ts2 = min(ts2, max(128, _round_up(spatial_tile, 128)))
    ts2 = min(ts2, hw128)

    # Pass 1: only the double-buffered f32 input tile per step (the stats
    # accumulators are resident), so its tile is a multiple of pass-2's.
    p1_bytes_per_col = 2 * 4 * cin_pad
    ts1_raw = max(128, (tile_budget // p1_bytes_per_col) // 128 * 128)
    ts1 = min(max(1, ts1_raw // ts2) * ts2, pl.cdiv(hw, ts2) * ts2)

    s_tiles1 = pl.cdiv(hw, ts1)
    ncores = num_tc if s_tiles1 >= num_tc else 1  # megacore split (v7x only)
    s_sub1 = pl.cdiv(s_tiles1, ncores)
    s_pad = ncores * s_sub1 * ts1                 # multiple of ts2 by construction
    if s_pad != hw:
        # Zero padding contributes 0 to s and G (sign(0)=0), so the statistics
        # stay exact when divided by the real element count m_real.
        x3 = jnp.pad(x3, ((0, 0), (0, 0), (0, s_pad - hw)))

    params_p1 = pltpu.CompilerParams(
        dimension_semantics=("parallel", "arbitrary", "arbitrary"),
        vmem_limit_bytes=vmem_limit)
    params_p2 = pltpu.CompilerParams(
        dimension_semantics=("parallel", "parallel"),
        vmem_limit_bytes=vmem_limit)

    # --- pass 1: Cout-independent statistics (Gram trick) --------------------
    part_gram, part_sum = pl.pallas_call(
        functools.partial(_stats_kernel, binarize_input=binarize_input),
        out_shape=(
            jax.ShapeDtypeStruct((ncores, cin, cin), jnp.float32),
            jax.ShapeDtypeStruct((ncores, cin, 1), jnp.float32),
        ),
        grid_spec=pltpu.PrefetchScalarGridSpec(
            num_scalar_prefetch=0,
            grid=(ncores, n, s_sub1),
            in_specs=[
                pl.BlockSpec((1, cin, ts1),
                             lambda c, b, s: (b, 0, c * s_sub1 + s)),
            ],
            out_specs=[
                pl.BlockSpec((1, cin, cin), lambda c, b, s: (c, 0, 0)),
                pl.BlockSpec((1, cin, 1), lambda c, b, s: (c, 0, 0)),
            ],
        ),
        compiler_params=params_p1,
    )(x3)

    # Fold BatchNorm (training-mode batch stats, biased variance) into a single
    # per-channel affine.  Tiny (Cout x Cin) / (Cin x Cin) XLA ops only.
    # TODO(synk): running_mean/running_var buffer updates (a training side
    # effect of nn.BatchNorm2d) are not modeled; the forward output does not
    # depend on them.
    gram = jnp.sum(part_gram, axis=0)             # (Cin, Cin)
    svec = jnp.sum(part_sum, axis=0)              # (Cin, 1)
    sum_y = wb32 @ svec                           # (Cout, 1)
    ssq_y = jnp.sum((wb32 @ gram) * wb32, axis=1, keepdims=True)
    mean = sum_y / m_real
    var = jnp.maximum(ssq_y / m_real - mean * mean, 0.0)   # biased variance
    g = gamma.reshape(cout, 1).astype(jnp.float32)
    bt = beta.reshape(cout, 1).astype(jnp.float32)
    scale = g / jnp.sqrt(var + eps)
    shift = bt - mean * scale

    # --- pass 2: binary conv, folded BN affine + Hardtanh ---------------------
    s_total2 = s_pad // ts2
    out3 = pl.pallas_call(
        functools.partial(_conv_bn_htanh_kernel,
                          binarize_input=binarize_input, int_matmul=int_matmul),
        out_shape=jax.ShapeDtypeStruct((n, cout, s_pad), out_dtype),
        grid_spec=pltpu.PrefetchScalarGridSpec(
            num_scalar_prefetch=0,
            grid=(n, s_total2),
            in_specs=[
                pl.BlockSpec((1, cin, ts2), lambda b, s: (b, 0, s)),
                pl.BlockSpec((cout, cin), lambda b, s: (0, 0)),
                pl.BlockSpec((cout, 1), lambda b, s: (0, 0)),
                pl.BlockSpec((cout, 1), lambda b, s: (0, 0)),
            ],
            out_specs=pl.BlockSpec((1, cout, ts2), lambda b, s: (b, 0, s)),
        ),
        compiler_params=params_p2,
    )(x3, w_mxu, scale, shift)

    if s_pad != hw:
        out3 = out3[:, :, :hw]
    return out3.reshape(n, cout, h, w_sp)


# ----------------------------------------------------------------------------
# Pure-JAX reference (same math, no Pallas) for a sanity check.
# ----------------------------------------------------------------------------
def _reference(x_nchw, weight, gamma, beta, eps=1e-5):
    n, cin, h, w_sp = x_nchw.shape
    cout = weight.shape[0]
    x_mat = jnp.transpose(x_nchw, (0, 2, 3, 1)).reshape(-1, cin)
    xb = jnp.sign(x_mat) if cin != 3 else x_mat
    wb = jnp.sign(weight.reshape(cout, cin))
    y = xb @ wb.T
    mean = y.mean(axis=0, keepdims=True)
    var = ((y - mean) ** 2).mean(axis=0, keepdims=True)
    yn = (y - mean) / jnp.sqrt(var + eps) * gamma.reshape(1, -1) + beta.reshape(1, -1)
    out = jnp.clip(yn, -1.0, 1.0)
    return jnp.transpose(out.reshape(n, h, w_sp, cout), (0, 3, 1, 2))


if __name__ == "__main__":
    # Small shapes consistent with the module: b=2, c=4, h=w=16, planes=2*c=8.
    key = jax.random.PRNGKey(0)
    kx, kw, kg, kb = jax.random.split(key, 4)

    N, CIN, H, W = 2, 4, 16, 16
    COUT = 2 * CIN                                # channels doubled

    x = jax.random.normal(kx, (N, CIN, H, W), dtype=jnp.float32)
    weight = jax.random.normal(kw, (COUT, CIN, 1, 1), dtype=jnp.float32) * 0.1
    gamma = 1.0 + 0.1 * jax.random.normal(kg, (COUT,), dtype=jnp.float32)
    beta = 0.1 * jax.random.normal(kb, (COUT,), dtype=jnp.float32)

    out = binary_conv2d_fusion_increase(x, weight, gamma, beta)
    out = jax.block_until_ready(out)

    ref = _reference(x, weight, gamma, beta)
    assert out.shape == (N, COUT, H, W)
    assert jnp.allclose(out, ref, atol=1e-4, rtol=1e-4), "mismatch vs reference"

    print("KERNEL_OK")
</pallas_src>

<mosaic_0001>
module attributes {stable_mosaic.version = 11 : i64} {
  func.func @_stats_kernel(%arg0: i32, %arg1: i32, %arg2: i32, %arg3: memref<1x4x256xf32, #tpu.memory_space<vmem>>, %arg4: memref<1x4x4xf32, #tpu.memory_space<vmem>>, %arg5: memref<1x4x1xf32, #tpu.memory_space<vmem>>) attributes {dimension_semantics = [#tpu.dimension_semantics<parallel>, #tpu.dimension_semantics<arbitrary>, #tpu.dimension_semantics<arbitrary>], iteration_bounds = array<i64: 1, 2, 1>, scalar_prefetch = 0 : i64, scratch_operands = 0 : i64, tpu.core_type = #tpu.core_type<tc>, window_params = [{transform_indices = @transform_0, window_bounds = array<i64: 1, 4, 256>}, {transform_indices = @transform_1, window_bounds = array<i64: 1, 4, 4>}, {transform_indices = @transform_2, window_bounds = array<i64: 1, 4, 1>}]} {
    %c0_i32 = arith.constant 0 : i32
    %0 = arith.cmpi eq, %arg1, %c0_i32 : i32
    %c0_i32_0 = arith.constant 0 : i32
    %1 = arith.cmpi eq, %arg2, %c0_i32_0 : i32
    %2 = arith.andi %0, %1 : i1
    %3 = arith.extui %2 : i1 to i32
    %c0_i32_1 = arith.constant 0 : i32
    %4 = arith.cmpi ne, %3, %c0_i32_1 : i32
    scf.if %4 {
      %cst_22 = arith.constant 0.000000e+00 : f32
      %32 = vector.broadcast %cst_22 : f32 to vector<1x4x4xf32>
      %c0_23 = arith.constant 0 : index
      %c0_24 = arith.constant 0 : index
      %c0_25 = arith.constant 0 : index
      %33 = vector.load %arg4[%c0_23, %c0_24, %c0_25] : memref<1x4x4xf32, #tpu.memory_space<vmem>>, vector<1x4x4xf32>
      tpu.vector_store %arg4[%c0_23, %c0_24, %c0_25], %32 {strides = array<i32>} : memref<1x4x4xf32, #tpu.memory_space<vmem>>, vector<1x4x4xf32>,
      %cst_26 = arith.constant 0.000000e+00 : f32
      %34 = vector.broadcast %cst_26 : f32 to vector<1x4x1xf32>
      %c0_27 = arith.constant 0 : index
      %c0_28 = arith.constant 0 : index
      %c0_29 = arith.constant 0 : index
      %35 = vector.load %arg5[%c0_27, %c0_28, %c0_29] : memref<1x4x1xf32, #tpu.memory_space<vmem>>, vector<1x4x1xf32>
      tpu.vector_store %arg5[%c0_27, %c0_28, %c0_29], %34 {strides = array<i32>} : memref<1x4x1xf32, #tpu.memory_space<vmem>>, vector<1x4x1xf32>,
    } else {
    }
    %c0 = arith.constant 0 : index
    %c0_2 = arith.constant 0 : index
    %c0_3 = arith.constant 0 : index
    %5 = vector.load %arg3[%c0, %c0_2, %c0_3] : memref<1x4x256xf32, #tpu.memory_space<vmem>>, vector<1x4x256xf32>
    %6 = vector.shape_cast %5 : vector<1x4x256xf32> to vector<4x256xf32>
    %cst = arith.constant 0.000000e+00 : f32
    %7 = vector.broadcast %cst : f32 to vector<4x256xf32>
    %8 = arith.cmpf ogt, %6, %7 : vector<4x256xf32>
    %cst_4 = arith.constant 0.000000e+00 : f32
    %9 = vector.broadcast %cst_4 : f32 to vector<4x256xf32>
    %10 = arith.cmpf olt, %6, %9 : vector<4x256xf32>
    %cst_5 = arith.constant -1.000000e+00 : f32
    %cst_6 = arith.constant 0.000000e+00 : f32
    %11 = vector.broadcast %cst_5 : f32 to vector<4x256xf32>
    %12 = vector.broadcast %cst_6 : f32 to vector<4x256xf32>
    %13 = arith.select %10, %11, %12 : vector<4x256xi1>, vector<4x256xf32>
    %cst_7 = arith.constant 1.000000e+00 : f32
    %14 = vector.broadcast %cst_7 : f32 to vector<4x256xf32>
    %15 = arith.select %8, %14, %13 : vector<4x256xi1>, vector<4x256xf32>
    %16 = arith.truncf %15 : vector<4x256xf32> to vector<4x256xbf16>
    %c0_8 = arith.constant 0 : index
    %c0_9 = arith.constant 0 : index
    %c0_10 = arith.constant 0 : index
    %17 = vector.load %arg5[%c0_8, %c0_9, %c0_10] : memref<1x4x1xf32, #tpu.memory_space<vmem>>, vector<1x4x1xf32>
    %18 = vector.shape_cast %17 : vector<1x4x1xf32> to vector<4x1xf32>
    %cst_11 = arith.constant dense<0.000000e+00> : vector<4xf32>
    %19 = vector.multi_reduction <add>, %15, %cst_11 [1] : vector<4x256xf32> to vector<4xf32>
    %20 = vector.shape_cast %19 : vector<4xf32> to vector<4x1xf32>
    %21 = arith.addf %18, %20 : vector<4x1xf32>
    %c0_12 = arith.constant 0 : index
    %c0_13 = arith.constant 0 : index
    %c0_14 = arith.constant 0 : index
    %22 = vector.load %arg5[%c0_12, %c0_13, %c0_14] : memref<1x4x1xf32, #tpu.memory_space<vmem>>, vector<1x4x1xf32>
    %23 = vector.shape_cast %22 : vector<1x4x1xf32> to vector<4x1xf32>
    %24 = vector.shape_cast %21 : vector<4x1xf32> to vector<1x4x1xf32>
    tpu.vector_store %arg5[%c0_12, %c0_13, %c0_14], %24 {strides = array<i32>} : memref<1x4x1xf32, #tpu.memory_space<vmem>>, vector<1x4x1xf32>,
    %c0_15 = arith.constant 0 : index
    %c0_16 = arith.constant 0 : index
    %c0_17 = arith.constant 0 : index
    %25 = vector.load %arg4[%c0_15, %c0_16, %c0_17] : memref<1x4x4xf32, #tpu.memory_space<vmem>>, vector<1x4x4xf32>
    %26 = vector.shape_cast %25 : vector<1x4x4xf32> to vector<4x4xf32>
    %cst_18 = arith.constant dense<0.000000e+00> : vector<4x4xf32>
    %27 = tpu.matmul %16, %16, %cst_18 {dimension_numbers = #tpu.dot_dimension_numbers<[1], [1], [0], [0], [0, 0, 1, 0], [], []>} : vector<4x256xbf16>, vector<4x256xbf16>, vector<4x4xf32> -> vector<4x4xf32>
    %28 = arith.addf %26, %27 : vector<4x4xf32>
    %c0_19 = arith.constant 0 : index
    %c0_20 = arith.constant 0 : index
    %c0_21 = arith.constant 0 : index
    %29 = vector.load %arg4[%c0_19, %c0_20, %c0_21] : memref<1x4x4xf32, #tpu.memory_space<vmem>>, vector<1x4x4xf32>
    %30 = vector.shape_cast %29 : vector<1x4x4xf32> to vector<4x4xf32>
    %31 = vector.shape_cast %28 : vector<4x4xf32> to vector<1x4x4xf32>
    tpu.vector_store %arg4[%c0_19, %c0_20, %c0_21], %31 {strides = array<i32>} : memref<1x4x4xf32, #tpu.memory_space<vmem>>, vector<1x4x4xf32>,
    return
  }
  func.func @transform_0(%arg0: i32, %arg1: i32, %arg2: i32) -> (i32, i32, i32) {
    %c1_i32 = arith.constant 1 : i32
    %0 = arith.muli %arg0, %c1_i32 : i32
    %1 = arith.addi %0, %arg2 : i32
    %c0_i32 = arith.constant 0 : i32
    %c0_i32_0 = arith.constant 0 : i32
    return %arg1, %c0_i32, %1 : i32, i32, i32
  }
  func.func @transform_1(%arg0: i32, %arg1: i32, %arg2: i32) -> (i32, i32, i32) {
    %c0_i32 = arith.constant 0 : i32
    %c0_i32_0 = arith.constant 0 : i32
    %c0_i32_1 = arith.constant 0 : i32
    return %arg0, %c0_i32, %c0_i32_0 : i32, i32, i32
  }
  func.func @transform_2(%arg0: i32, %arg1: i32, %arg2: i32) -> (i32, i32, i32) {
    %c0_i32 = arith.constant 0 : i32
    %c0_i32_0 = arith.constant 0 : i32
    %c0_i32_1 = arith.constant 0 : i32
    return %arg0, %c0_i32, %c0_i32_0 : i32, i32, i32
  }
}

</mosaic_0001>

<bundles_post_ra>
// kernel: tpu_custom_call.1
= control target key start
LH: loop header
LB: loop body
LE: loop exit
PB: predicated region body
PF: predicated region fallthrough
CT: control target
= control target key end

     0   :  { %8 = vsyncpa [#allocation3], 0  ;;  %s703_s0 = inlined_call_operand.hbm [shape: f32[2,4,256], index: 0, kind: input, shape index: {}]   ;;  %s704_s1 = inlined_call_operand.hbm [shape: f32[1,4,4], index: 1, kind: output, shape index: {0}]   ;;  %s705_s2 = inlined_call_operand.vmem [shape: f32[1,4,1], index: 2, kind: output, shape index: {1}]  }
   0x1   :  { %10 = vsyncpa [#allocation3 + $0x1], 0 }
   0x2   :  { %11 = vsyncpa [#allocation4], 0  ;;  %s579_s9 = smov 0   ;;  %s581_s10 = smov 0  }
   0x3   :  { %s583_s11 = smov 0   ;;  %s585_s12 = smov 0  }
   0x4   :  { %s587_s13 = smov 0   ;;  %s589_s14 = smov 0  }
   0x5 LB: > { %s372_s15 = sadd.s32 4294967295, %s558_s14   ;;  %s32_s16 = sadd.s32 1, %s554_s13  ;;  %s558_s14 = sphi %s589_s14, %s17_s14   ;;  %s554_s13 = sphi %s587_s13, %s714_s13   ;;  %s550_s12 = sphi %s585_s12, %s713_s12   ;;  %s546_s11 = sphi %s583_s11, %s712_s11   ;;  %s542_s10 = sphi %s581_s10, %s711_s10   ;;  %s538_s9 = sphi %s579_s9, %s710_s9  }
   0x6   : > { %p34_p0 = scmp.ge.s32.totalorder %s32_s16, 2  ;;  %s47_s17 = sadd.s32 1, %s546_s11 }
   0x7   : > { %p54_p1 = scmp.ne.s32.totalorder %s546_s11, %s542_s10  ;;  %p55_p2 = scmp.eq.s32.totalorder %s558_s14, 0 }
   0x8   : > { %s716_s16 = smov (%p34_p0, %s32_s16), 0  ;;  %p60_p4 = scmp.ne.s32.totalorder %s542_s10, %s538_s9 }
   0x9   : > { %p615_p3 = por %p55_p2, %p54_p1  ;;  %s42_s19 = ssub.s32 %s554_s13, %s716_s16 }
   0xa   : > { %p61_p5 = scmp.eq.s32.totalorder %s372_s15, 0  ;;  %p45_p6 = scmp.eq.s32.totalorder %s42_s19, 0 }
   0xb   : > { %p398_p8 = scmp.lt.s32.totalorder %s558_s14, 2  ;;  %s136_s22 = sand.u32 1, %s546_s11  }
   0xc   : > { %p624_p7 = por %p61_p5, %p60_p4  ;;  %s386_s23 = sshll.u32 %s554_s13, 7 }
   0xd   : > { %s630_s21 = scalar_select %p45_p6, %s546_s11, %s47_s17  }
   0xe   : > { %s375_s24 = sshll.u32 %s136_s22, 3  ;;  %s149_s27 = scalar_lea.hbm %s703_s0, %s386_s23 }
   0xf   : > { %s140_s28 = scalar_lea.vmem [#allocation2], %s375_s24  ;;  %p639_p9 = pnand %p398_p8, %p615_p3 }
  0x10   : > { %s151_s29 = sshll.u32 %s140_s28, 4  ;;  %p378_p10 = scmp.ge.s32.totalorder %s558_s14, 1  ;;  %s152_s29 = int_to_ptr.vmem [resolvable:$true] %s151_s29 }
  0x11   : > { %p156_p11 = scmp.lt.s32.totalorder %s558_s14, 3  ;;  %s137_s3 = scalar_lea.sflag [#allocation3], %s136_s22 }
  0x12   : > { %p454_p12 = pneg %p639_p9  ;;  %s465_s4 = scalar_lea.vmem %s152_s29, 128 }
  0x13   : > { %p466_p13 = scmp.ne.s32.totalorder %s152_s29, %s465_s4  ;;  %s560_s5 = smov [#allocation2]  }
  0x14   : > { %s470_s6 = sshll.u32 %s560_s5, 4  ;;  %s471_s6 = int_to_ptr.vmem [resolvable:$false] %s470_s6 }
  0x15   : > { %p468_p0 = pnand %p466_p13, %p454_p12  ;;  %s472_s7 = scalar_lea.vmem %s471_s6, 256 }
  0x16   : > { %p473_p2 = scmp.lt.s32.totalorder %s152_s29, %s471_s6  ;;  %p474_p3 = scmp.lt.s32.totalorder %s472_s7, %s465_s4 }
  0x17   : > { %p469_p1 = pneg %p468_p0 }
  0x18   : > { %p475_p4 = por %p474_p3, %p473_p2 }
  0x1a   : > { %p476_p5 = pnand %p475_p4, %p469_p1 }
  0x1c   : > { %479 = shalt.err (!%p476_p5)
}
  0x1d   : > { %397 = dma.hbm_to_vmem [thread:$0]  (!%p639_p9), %s149_s27, 128, %s152_s29, %s137_s3  }
  0x1e   : > { %p157_p6 = pnand %p378_p10, %p156_p11 }
  0x1f   : > { %s162_s8 = sand.u32 (!%p157_p6), 1, %s542_s10  }
  0x20   : > { %160 = sbr.rel (%p157_p6) target bundleno = 262 (0x106), region = 24  ;;  %s379_s9 = sshll.u32 (!%p157_p6), %s162_s8, 3 }
  0x21   : > { %s163_s17 = scalar_lea.sflag (!%p157_p6), [#allocation3], %s162_s8  ;;  %s166_s18 = scalar_lea.vmem (!%p157_p6), [#allocation2], %s379_s9 }
  0x25   : > { %529 = dma.done.wait (%p624_p7), %s163_s17, 128  }
  0x26   : > { %531 = vsyncadd (%p624_p7), %s163_s17, 4294967168  ;;  %p193_p8 = scmp.eq.s32.totalorder %s550_s12, 0 }
  0x27   : > { %vm199_vm0 = vcmask (%p193_p8), 27648   ;;  %vm201_vm1 = vcmask (%p193_p8), 3072   ;;  %v561_v0 = vmov (%p193_p8), 0.0  }
  0x28   : > { %198 = sbr.rel (!%p193_p8) target bundleno = 45 (0x2d), region = 32  ;;  %200 = vst.msk [vmem:[#allocation5] sm:$0xf] (%p193_p8), %vm199_vm0, %v561_v0 }
  0x29   : > { %202 = vst.msk [vmem:[%s705_s2] sm:$0xf] (%p193_p8), %vm201_vm1, %v561_v0 }
  0x2d PF: > { %v203_v1 = vld [vmem:[%s166_s18] sm:$0xff]  ;;  %vm214_vm4 = vcmask 1043456   ;;  %v562_v2 = vmov 0.0   ;;  %vm221_vm5 = vcmask 3072   ;;  %s563_s25 = smov [#allocation5]   ;;  %vm265_vm6 = vcmask 27648  }
  0x2e   : > { %vm204_vm2 = vcmp.gt.f32.partialorder %v203_v1, 0.0  ;;  %vm205_vm3 = vcmp.lt.f32.partialorder %v203_v1, 0.0  ;;  %s280_s26 = sshll.u32 %s563_s25, 4  ;;  %p670_p7 = scmp.eq.s32.totalorder %s372_s15, 1  ;;  %s281_s26 = int_to_ptr.vmem [resolvable:$true] %s280_s26 }
  0x2f   : > { %v206_v3 = vsel %vm205_vm3, -1.0, %v562_v2  ;;  %v223_v14 = vld [vmem:[#allocation5] sm:$0xf]  ;;  %s480_s28 = scalar_lea.vmem %s281_s26, 64  ;;  %p487_p12 = scmp.lt.s32.totalorder %s281_s26, %s281_s26 }
  0x30   : > { %v207_v4 = vsel %vm204_vm2, 1.0, %v206_v3  ;;  %v213_v11 = vld [vmem:[%s705_s2] sm:$0xf]  ;;  %p481_p9 = scmp.ne.s32.totalorder %s281_s26, %s480_s28  ;;  %p488_p13 = scmp.lt.s32.totalorder %s480_s28, %s480_s28 }
  0x31   : > { %v209_v5 = vcombine.high %v207_v4, %v207_v4  ;;  %v215_v6 = vsel %vm214_vm4, %v207_v4, 0.0  ;;  %v211_v7 = vpack.c.bf16 %v207_v4, %v207_v4 }
  0x32   : > { %p482_p10 = pnand %p481_p9, %p670_p7  ;;  %p489_p0 = por %p488_p13, %p487_p12 }
  0x33   : > { %v212_v8 = vpack.c.bf16 %v209_v5, %v209_v5  ;;  %v216_v9 = vsel %vm214_vm4, %v209_v5, 0.0 }
  0x34   : > { %v217_v10 = vadd.f32 %v216_v9, %v215_v6  ;;  %p483_p11 = pneg %p482_p10 }
  0x35   : > { %238 = vmatprep.subr.bf16.mxu0 %v212_v8  ;;  %256 = vmatprep.mubr.bf16.mxu0 %v212_v8 }
  0x36   : > { %239 = vmatpush1.bf16.xpose.msra.mxu0 %v211_v7  ;;  %218 = vadd.xlane.f32.xlu0 %v217_v10  ;;  %p490_p1 = pnand %p489_p0, %p483_p11 }
  0x3d   : > { %257 = vmatmul.mubr.bf16.vlgmr.msra.gmra.mxu0 %v211_v7 }
  0xbf   : > { %v219_v12 = vpop.xlane.xlu0 %218 }
  0xc0   : > { %v220_v13 = vadd.f32 %v219_v12, %v213_v11 }
  0xc2   : > { %222 = vst.msk [vmem:[%s705_s2] sm:$0xf] %vm221_vm5, %v220_v13 }
  0xfd   : > { %v258_v15 = vpop.f32.mrf.mxu0 }
  0xfe   : > { %v264_v16 = vadd.f32 %v258_v15, %v223_v14 }
  0xff   : > { %v260_v17 = vpop.f32.mrf.mxu0 }
 0x100   : > { %266 = vst.msk [vmem:[#allocation5] sm:$0xf] %vm265_vm6, %v264_v16 }
 0x101   : > { %v261_v18 = vpop.f32.mrf.mxu0 }
 0x102   : > { %493 = shalt.err (!%p490_p1)
}
 0x103   : > { %391 = dma.vmem_to_hbm [thread:$0]  (%p670_p7), %s281_s26, 64, %s704_s1, [#allocation4]   ;;  %v262_v19 = vpop.f32.mrf.mxu0 }
 0x104   : > { %533 = dma.done.wait (%p670_p7), [#allocation4], 64  }
 0x105   : > { %535 = vsyncadd (%p670_p7), [#allocation4], 4294967232 }
 0x106 PF: > { %s17_s14 = sadd.s32 1, %s558_s14   ;;  %s710_s9 = smov %s542_s10 }
 0x107   : > { %p14_p2 = scmp.ge.s32.totalorder %s17_s14, 4   ;;  %s711_s10 = smov %s546_s11 }
 0x108   : > { %s712_s11 = smov %s630_s21  ;;  %s713_s12 = smov %s554_s13 }
 0x109   : > { %s714_s13 = smov %s716_s16  ;;  %16 = sbr.rel (!%p14_p2) target bundleno = 5 (0x5), region = 78 }
 0x10e   :  { %303 = vsyncpa [#allocation3], 1 }
 0x10f   :  { %305 = vsyncpa [#allocation3 + $0x1], 1 }
 0x110   :  { %306 = vsyncpa [#allocation4], 1 }
 0x111   :  { %308 = vsyncpa [#allocation4 + $0x1], 1 }

</bundles_post_ra>
